<compile_context>
chip_gen: v7x
topology: tpu7x:2x2x1
jax: 0.10.0
libtpu: 0.0.40
codegen_flags: <defaults>
</compile_context>

<pallas_src>
import functools

import jax
import jax.numpy as jnp
import numpy as np
from jax.experimental import pallas as pl
from jax.experimental.pallas import tpu as pltpu


def _round_up(x, m):
    return ((x + m - 1) // m) * m


def _pool_bins(size, k):
    """PyTorch AdaptiveAvgPool2d bin boundaries (static python ints)."""
    return [((i * size) // k, -((-(i + 1) * size) // k)) for i in range(k)]


def _build_pool_matrix(H, W, HWp):
    """Static (HWp, 35) pooling matrix.

    col 0      : AdaptiveAvgPool2d(1)
    cols 1..9  : AdaptiveAvgPool2d(3) bins, row-major
    cols 10..34: AdaptiveAvgPool2d(5) bins, row-major
    Entry [i*W + j, col] = 1/area if valid-conv output pixel (i, j) lies in the
    bin, else 0.  Rows for i >= H-2, j >= W-2 and the lane padding HW..HWp-1
    stay 0, which also masks the junk lanes from the shift-without-crop taps.
    """
    Ho, Wo = H - 2, W - 2
    P = np.zeros((HWp, 1 + 9 + 25), np.float32)
    col = 0
    for k in (1, 3, 5):
        hb, wb = _pool_bins(Ho, k), _pool_bins(Wo, k)
        for (h0, h1) in hb:
            for (w0, w1) in wb:
                inv_area = 1.0 / float((h1 - h0) * (w1 - w0))
                for i in range(h0, h1):
                    for j in range(w0, w1):
                        P[i * W + j, col] = inv_area
                col += 1
    return P


def _mscam_kernel(x_ref, wtaps_ref, pool_ref, wcat_ref, wexp_ref, out_ref,
                  xb16_ref, *, W, HWp, Bt):
    f32 = jnp.float32
    bf16 = jnp.bfloat16

    def one_image(b):
        # One f32 pass over the padded image into a bf16 VMEM scratch; the 9
        # lane-shifted tap slices below then move half the bytes.
        xb16_ref[...] = x_ref[b].astype(bf16)

        # channel_reduction (3x3 valid conv) = 9 accumulating MXU matmuls,
        # bf16 operands + f32 accumulation.  No im2col slab is materialized.
        y = None
        for dy in range(3):
            for dx in range(3):
                tap = dy * 3 + dx
                off = dy * W + dx
                part = jnp.dot(wtaps_ref[tap], xb16_ref[:, off:off + HWp],
                               preferred_element_type=f32)
                y = part if y is None else y + part
        # Lanes of cropped / padded output pixels carry finite junk (zeros or
        # wrong-tap combinations of real x); the pool matrix holds exact zeros
        # there, so no extra masking is needed.
        y = y * jax.nn.sigmoid(y)                     # SiLU, f32 on VPU/EUP

        # All three adaptive average pools (1 / 3 / 5) in one matmul against
        # the static pooling matrix.
        pooled = jnp.dot(y.astype(bf16), pool_ref[...],
                         preferred_element_type=f32)  # (c_, 35)

        # Depthwise branch convs -> (3*c_, 1) in torch.cat([y1, y2, y4]) order.
        prod = pooled * wcat_ref[...]
        cat = jnp.concatenate(
            [prod[:, 0:1],                                        # conv1 (1x1)
             jnp.sum(prod[:, 1:10], axis=1, keepdims=True),       # conv2 (3x3)
             jnp.sum(prod[:, 10:35], axis=1, keepdims=True)],     # conv4 (5x5)
            axis=0)

        # channel_expansion (1x1 conv) + sigmoid -> per-channel attention.
        att = jax.nn.sigmoid(
            jnp.dot(wexp_ref[...], cat, preferred_element_type=f32))  # (c1, 1)

        # Epilogue: re-read x from VMEM (3 vld slots/cycle, nearly free) so the
        # f32 image is never live across the matmuls; lane-dense block store.
        out_ref[b] = (x_ref[b, :, :HWp] * att).astype(out_ref.dtype)

    if Bt == 1:
        one_image(0)
    else:
        jax.lax.fori_loop(0, Bt, lambda b, c: (one_image(b), c)[1], 0,
                          unroll=True)


def _choose_bt(B, bytes_per_image):
    """Images per grid step: amortize the ~0.35us per-step overhead while
    (a) keeping the double-buffered x/out blocks inside a modest VMEM budget
    and (b) keeping >= 2 parallel grid steps when B >= 2 (v7x has 2 TCs)."""
    budget = 8 * 1024 * 1024
    best = 1
    for cand in range(1, B + 1):
        if B % cand:
            continue
        if cand * bytes_per_image > budget:
            continue
        if B >= 2 and B // cand < 2:
            continue
        best = cand
    return best


def mscam_v4(x, params):
    B, c1, H, W = x.shape
    c_ = params["w1"].shape[0]
    HW = H * W
    HWp = _round_up(HW, 128)                 # lane-dense output / y tiles
    Lin = HWp + _round_up(2 * W + 2, 128)    # room for the 9 tap offsets

    # Host-side layout plumbing: lane-dense flattened + zero-padded image.
    x_pad = jnp.pad(x.reshape(B, c1, HW), ((0, 0), (0, 0), (0, Lin - HW)))

    # Per-tap reduction weights: wtaps[dy*3+dx] == wred[:, :, dy, dx], bf16.
    w_taps = jnp.asarray(params["wred"]).transpose(2, 3, 0, 1) \
                                        .reshape(9, c_, c1).astype(jnp.bfloat16)

    # Static pooling matrix (bf16) and per-channel depthwise weights (f32).
    pool_mat = jnp.asarray(_build_pool_matrix(H, W, HWp)).astype(jnp.bfloat16)
    wcat = jnp.concatenate([params["w1"].reshape(c_, 1),
                            params["w2"].reshape(c_, 9),
                            params["w4"].reshape(c_, 25)],
                           axis=1).astype(jnp.float32)               # (c_, 35)
    wexp = params["wexp"].astype(jnp.float32)                        # (c1, 3c_)

    itemsize = x.dtype.itemsize
    bytes_per_image = 2 * c1 * (Lin + HWp) * itemsize   # dbl-buffered in + out
    Bt = _choose_bt(B, bytes_per_image)
    grid = (B // Bt,)

    # Explicit VMEM budget (conservative: fits v7x's smaller VMEM).
    weight_bytes = (9 * c_ * c1 * 2 + HWp * 35 * 2 + c_ * 35 * 4
                    + c1 * 3 * c_ * 4)
    need = (Bt * bytes_per_image + 2 * weight_bytes + c1 * Lin * 2)
    vmem_limit = int(min(64 * 2**20, max(32 * 2**20, int(1.5 * need))))

    kernel = functools.partial(_mscam_kernel, W=W, HWp=HWp, Bt=Bt)
    out_flat = pl.pallas_call(
        kernel,
        out_shape=jax.ShapeDtypeStruct((B, c1, HWp), x.dtype),
        grid=grid,
        in_specs=[
            pl.BlockSpec((Bt, c1, Lin), lambda g: (g, 0, 0)),
            pl.BlockSpec((9, c_, c1), lambda g: (0, 0, 0)),
            pl.BlockSpec((HWp, 35), lambda g: (0, 0)),
            pl.BlockSpec((c_, 35), lambda g: (0, 0)),
            pl.BlockSpec((c1, 3 * c_), lambda g: (0, 0)),
        ],
        out_specs=pl.BlockSpec((Bt, c1, HWp), lambda g: (g, 0, 0)),
        scratch_shapes=[pltpu.VMEM((c1, Lin), jnp.bfloat16)],
        compiler_params=pltpu.CompilerParams(
            dimension_semantics=("parallel",),
            vmem_limit_bytes=vmem_limit),
    )(x_pad, w_taps, pool_mat, wcat, wexp)
    return out_flat[:, :, :HW].reshape(B, c1, H, W)


def ref_forward(x, params):
    """Pure-JAX reference (HIGHEST precision) matching PyTorch MSCAMv4."""
    hi = jax.lax.Precision.HIGHEST
    y = jax.lax.conv_general_dilated(
        x, params["wred"], window_strides=(1, 1), padding="VALID",
        dimension_numbers=("NCHW", "OIHW", "NCHW"), precision=hi)
    y = jax.nn.silu(y)

    def adaptive_pool(t, k):
        rows = []
        for (h0, h1) in _pool_bins(t.shape[2], k):
            cols = []
            for (w0, w1) in _pool_bins(t.shape[3], k):
                cols.append(jnp.mean(t[:, :, h0:h1, w0:w1], axis=(2, 3)))
            rows.append(jnp.stack(cols, axis=-1))
        return jnp.stack(rows, axis=-2)               # (B, C, k, k)

    y1 = adaptive_pool(y, 1) * params["w1"].reshape(1, -1, 1, 1)
    y2 = jnp.sum(adaptive_pool(y, 3) * params["w2"][None], axis=(2, 3),
                 keepdims=True)
    y4 = jnp.sum(adaptive_pool(y, 5) * params["w4"][None], axis=(2, 3),
                 keepdims=True)
    cat = jnp.concatenate([y1, y2, y4], axis=1)       # (B, 3*c_, 1, 1)
    att = jax.nn.sigmoid(
        jnp.einsum("oj,bjhw->bohw", params["wexp"], cat, precision=hi))
    return x * att


if __name__ == "__main__":
    B, c1, c_, H, W = 2, 8, 4, 16, 16

    key = jax.random.PRNGKey(0)
    ks = jax.random.split(key, 6)
    params = {
        "wred": jax.random.normal(ks[0], (c_, c1, 3, 3), jnp.float32) * 0.2,
        "w1":   jax.random.normal(ks[1], (c_,),          jnp.float32) * 0.5,
        "w2":   jax.random.normal(ks[2], (c_, 3, 3),     jnp.float32) * 0.3,
        "w4":   jax.random.normal(ks[3], (c_, 5, 5),     jnp.float32) * 0.2,
        "wexp": jax.random.normal(ks[4], (c1, 3 * c_),   jnp.float32) * 0.3,
    }
    x = jax.random.normal(ks[5], (B, c1, H, W), jnp.float32)

    out = jax.block_until_ready(jax.jit(mscam_v4)(x, params))
    ref = jax.block_until_ready(ref_forward(x, params))

    assert out.shape == x.shape and out.dtype == x.dtype
    # Kernel uses single-pass bf16 MXU matmuls (per perf review); reference is
    # f32 HIGHEST, so the tolerance is looser than f32-vs-f32 would need.
    if not np.allclose(np.asarray(out), np.asarray(ref), rtol=2e-2, atol=3e-2):
        err = np.max(np.abs(np.asarray(out) - np.asarray(ref)))
        raise AssertionError(f"Pallas kernel does not match reference, max abs err={err}")
    print("KERNEL_OK")
</pallas_src>

<mosaic_0001>
module attributes {stable_mosaic.version = 11 : i64} {
  func.func @_mscam_kernel(%arg0: i32, %arg1: memref<1x8x384xf32, #tpu.memory_space<vmem>>, %arg2: memref<9x4x8xbf16, #tpu.memory_space<vmem>>, %arg3: memref<256x35xbf16, #tpu.memory_space<vmem>>, %arg4: memref<4x35xf32, #tpu.memory_space<vmem>>, %arg5: memref<8x12xf32, #tpu.memory_space<vmem>>, %arg6: memref<1x8x256xf32, #tpu.memory_space<vmem>>, %arg7: memref<8x384xbf16, #tpu.memory_space<vmem>>) attributes {dimension_semantics = [#tpu.dimension_semantics<parallel>], iteration_bounds = array<i64: 2>, scalar_prefetch = 0 : i64, scratch_operands = 1 : i64, tpu.core_type = #tpu.core_type<tc>, window_params = [{transform_indices = @transform_0, window_bounds = array<i64: 1, 8, 384>}, {pipeline_mode = #tpu.pipeline_mode<synchronous>, transform_indices = @transform_1, window_bounds = array<i64: 9, 4, 8>}, {pipeline_mode = #tpu.pipeline_mode<synchronous>, transform_indices = @transform_2, window_bounds = array<i64: 256, 35>}, {pipeline_mode = #tpu.pipeline_mode<synchronous>, transform_indices = @transform_3, window_bounds = array<i64: 4, 35>}, {pipeline_mode = #tpu.pipeline_mode<synchronous>, transform_indices = @transform_4, window_bounds = array<i64: 8, 12>}, {transform_indices = @transform_5, window_bounds = array<i64: 1, 8, 256>}]} {
    %c0 = arith.constant 0 : index
    %c0_0 = arith.constant 0 : index
    %c0_1 = arith.constant 0 : index
    %0 = vector.load %arg1[%c0, %c0_0, %c0_1] : memref<1x8x384xf32, #tpu.memory_space<vmem>>, vector<1x8x384xf32>
    %1 = vector.shape_cast %0 : vector<1x8x384xf32> to vector<8x384xf32>
    %2 = arith.truncf %1 : vector<8x384xf32> to vector<8x384xbf16>
    %c0_2 = arith.constant 0 : index
    %c0_3 = arith.constant 0 : index
    %3 = vector.load %arg7[%c0_2, %c0_3] : memref<8x384xbf16, #tpu.memory_space<vmem>>, vector<8x384xbf16>
    tpu.vector_store %arg7[%c0_2, %c0_3], %2 {strides = array<i32>} : memref<8x384xbf16, #tpu.memory_space<vmem>>, vector<8x384xbf16>,
    %c0_4 = arith.constant 0 : index
    %c0_5 = arith.constant 0 : index
    %c0_6 = arith.constant 0 : index
    %4 = vector.load %arg2[%c0_4, %c0_5, %c0_6] : memref<9x4x8xbf16, #tpu.memory_space<vmem>>, vector<1x4x8xbf16>
    %5 = vector.shape_cast %4 : vector<1x4x8xbf16> to vector<4x8xbf16>
    %c0_7 = arith.constant 0 : index
    %c0_8 = arith.constant 0 : index
    %6 = vector.load %arg7[%c0_7, %c0_8] : memref<8x384xbf16, #tpu.memory_space<vmem>>, vector<8x256xbf16>
    %cst = arith.constant dense<0.000000e+00> : vector<4x256xf32>
    %7 = tpu.matmul %5, %6, %cst {dimension_numbers = #tpu.dot_dimension_numbers<[1], [0], [0], [1], [0, 0, 1, 1], [], []>} : vector<4x8xbf16>, vector<8x256xbf16>, vector<4x256xf32> -> vector<4x256xf32>
    %c1 = arith.constant 1 : index
    %c0_9 = arith.constant 0 : index
    %c0_10 = arith.constant 0 : index
    %8 = vector.load %arg2[%c1, %c0_9, %c0_10] : memref<9x4x8xbf16, #tpu.memory_space<vmem>>, vector<1x4x8xbf16>
    %9 = vector.shape_cast %8 : vector<1x4x8xbf16> to vector<4x8xbf16>
    %c0_11 = arith.constant 0 : index
    %c1_12 = arith.constant 1 : index
    %10 = vector.load %arg7[%c0_11, %c1_12] : memref<8x384xbf16, #tpu.memory_space<vmem>>, vector<8x256xbf16>
    %cst_13 = arith.constant dense<0.000000e+00> : vector<4x256xf32>
    %11 = tpu.matmul %9, %10, %cst_13 {dimension_numbers = #tpu.dot_dimension_numbers<[1], [0], [0], [1], [0, 0, 1, 1], [], []>} : vector<4x8xbf16>, vector<8x256xbf16>, vector<4x256xf32> -> vector<4x256xf32>
    %12 = arith.addf %7, %11 : vector<4x256xf32>
    %c2 = arith.constant 2 : index
    %c0_14 = arith.constant 0 : index
    %c0_15 = arith.constant 0 : index
    %13 = vector.load %arg2[%c2, %c0_14, %c0_15] : memref<9x4x8xbf16, #tpu.memory_space<vmem>>, vector<1x4x8xbf16>
    %14 = vector.shape_cast %13 : vector<1x4x8xbf16> to vector<4x8xbf16>
    %c0_16 = arith.constant 0 : index
    %c2_17 = arith.constant 2 : index
    %15 = vector.load %arg7[%c0_16, %c2_17] : memref<8x384xbf16, #tpu.memory_space<vmem>>, vector<8x256xbf16>
    %cst_18 = arith.constant dense<0.000000e+00> : vector<4x256xf32>
    %16 = tpu.matmul %14, %15, %cst_18 {dimension_numbers = #tpu.dot_dimension_numbers<[1], [0], [0], [1], [0, 0, 1, 1], [], []>} : vector<4x8xbf16>, vector<8x256xbf16>, vector<4x256xf32> -> vector<4x256xf32>
    %17 = arith.addf %12, %16 : vector<4x256xf32>
    %c3 = arith.constant 3 : index
    %c0_19 = arith.constant 0 : index
    %c0_20 = arith.constant 0 : index
    %18 = vector.load %arg2[%c3, %c0_19, %c0_20] : memref<9x4x8xbf16, #tpu.memory_space<vmem>>, vector<1x4x8xbf16>
    %19 = vector.shape_cast %18 : vector<1x4x8xbf16> to vector<4x8xbf16>
    %c0_21 = arith.constant 0 : index
    %c16 = arith.constant 16 : index
    %20 = vector.load %arg7[%c0_21, %c16] : memref<8x384xbf16, #tpu.memory_space<vmem>>, vector<8x256xbf16>
    %cst_22 = arith.constant dense<0.000000e+00> : vector<4x256xf32>
    %21 = tpu.matmul %19, %20, %cst_22 {dimension_numbers = #tpu.dot_dimension_numbers<[1], [0], [0], [1], [0, 0, 1, 1], [], []>} : vector<4x8xbf16>, vector<8x256xbf16>, vector<4x256xf32> -> vector<4x256xf32>
    %22 = arith.addf %17, %21 : vector<4x256xf32>
    %c4 = arith.constant 4 : index
    %c0_23 = arith.constant 0 : index
    %c0_24 = arith.constant 0 : index
    %23 = vector.load %arg2[%c4, %c0_23, %c0_24] : memref<9x4x8xbf16, #tpu.memory_space<vmem>>, vector<1x4x8xbf16>
    %24 = vector.shape_cast %23 : vector<1x4x8xbf16> to vector<4x8xbf16>
    %c0_25 = arith.constant 0 : index
    %c17 = arith.constant 17 : index
    %25 = vector.load %arg7[%c0_25, %c17] : memref<8x384xbf16, #tpu.memory_space<vmem>>, vector<8x256xbf16>
    %cst_26 = arith.constant dense<0.000000e+00> : vector<4x256xf32>
    %26 = tpu.matmul %24, %25, %cst_26 {dimension_numbers = #tpu.dot_dimension_numbers<[1], [0], [0], [1], [0, 0, 1, 1], [], []>} : vector<4x8xbf16>, vector<8x256xbf16>, vector<4x256xf32> -> vector<4x256xf32>
    %27 = arith.addf %22, %26 : vector<4x256xf32>
    %c5 = arith.constant 5 : index
    %c0_27 = arith.constant 0 : index
    %c0_28 = arith.constant 0 : index
    %28 = vector.load %arg2[%c5, %c0_27, %c0_28] : memref<9x4x8xbf16, #tpu.memory_space<vmem>>, vector<1x4x8xbf16>
    %29 = vector.shape_cast %28 : vector<1x4x8xbf16> to vector<4x8xbf16>
    %c0_29 = arith.constant 0 : index
    %c18 = arith.constant 18 : index
    %30 = vector.load %arg7[%c0_29, %c18] : memref<8x384xbf16, #tpu.memory_space<vmem>>, vector<8x256xbf16>
    %cst_30 = arith.constant dense<0.000000e+00> : vector<4x256xf32>
    %31 = tpu.matmul %29, %30, %cst_30 {dimension_numbers = #tpu.dot_dimension_numbers<[1], [0], [0], [1], [0, 0, 1, 1], [], []>} : vector<4x8xbf16>, vector<8x256xbf16>, vector<4x256xf32> -> vector<4x256xf32>
    %32 = arith.addf %27, %31 : vector<4x256xf32>
    %c6 = arith.constant 6 : index
    %c0_31 = arith.constant 0 : index
    %c0_32 = arith.constant 0 : index
    %33 = vector.load %arg2[%c6, %c0_31, %c0_32] : memref<9x4x8xbf16, #tpu.memory_space<vmem>>, vector<1x4x8xbf16>
    %34 = vector.shape_cast %33 : vector<1x4x8xbf16> to vector<4x8xbf16>
    %c0_33 = arith.constant 0 : index
    %c32 = arith.constant 32 : index
    %35 = vector.load %arg7[%c0_33, %c32] : memref<8x384xbf16, #tpu.memory_space<vmem>>, vector<8x256xbf16>
    %cst_34 = arith.constant dense<0.000000e+00> : vector<4x256xf32>
    %36 = tpu.matmul %34, %35, %cst_34 {dimension_numbers = #tpu.dot_dimension_numbers<[1], [0], [0], [1], [0, 0, 1, 1], [], []>} : vector<4x8xbf16>, vector<8x256xbf16>, vector<4x256xf32> -> vector<4x256xf32>
    %37 = arith.addf %32, %36 : vector<4x256xf32>
    %c7 = arith.constant 7 : index
    %c0_35 = arith.constant 0 : index
    %c0_36 = arith.constant 0 : index
    %38 = vector.load %arg2[%c7, %c0_35, %c0_36] : memref<9x4x8xbf16, #tpu.memory_space<vmem>>, vector<1x4x8xbf16>
    %39 = vector.shape_cast %38 : vector<1x4x8xbf16> to vector<4x8xbf16>
    %c0_37 = arith.constant 0 : index
    %c33 = arith.constant 33 : index
    %40 = vector.load %arg7[%c0_37, %c33] : memref<8x384xbf16, #tpu.memory_space<vmem>>, vector<8x256xbf16>
    %cst_38 = arith.constant dense<0.000000e+00> : vector<4x256xf32>
    %41 = tpu.matmul %39, %40, %cst_38 {dimension_numbers = #tpu.dot_dimension_numbers<[1], [0], [0], [1], [0, 0, 1, 1], [], []>} : vector<4x8xbf16>, vector<8x256xbf16>, vector<4x256xf32> -> vector<4x256xf32>
    %42 = arith.addf %37, %41 : vector<4x256xf32>
    %c8 = arith.constant 8 : index
    %c0_39 = arith.constant 0 : index
    %c0_40 = arith.constant 0 : index
    %43 = vector.load %arg2[%c8, %c0_39, %c0_40] : memref<9x4x8xbf16, #tpu.memory_space<vmem>>, vector<1x4x8xbf16>
    %44 = vector.shape_cast %43 : vector<1x4x8xbf16> to vector<4x8xbf16>
    %c0_41 = arith.constant 0 : index
    %c34 = arith.constant 34 : index
    %45 = vector.load %arg7[%c0_41, %c34] : memref<8x384xbf16, #tpu.memory_space<vmem>>, vector<8x256xbf16>
    %cst_42 = arith.constant dense<0.000000e+00> : vector<4x256xf32>
    %46 = tpu.matmul %44, %45, %cst_42 {dimension_numbers = #tpu.dot_dimension_numbers<[1], [0], [0], [1], [0, 0, 1, 1], [], []>} : vector<4x8xbf16>, vector<8x256xbf16>, vector<4x256xf32> -> vector<4x256xf32>
    %47 = arith.addf %42, %46 : vector<4x256xf32>
    %48 = arith.negf %47 : vector<4x256xf32>
    %49 = math.exp %48 : vector<4x256xf32>
    %cst_43 = arith.constant 1.000000e+00 : f32
    %50 = vector.broadcast %cst_43 : f32 to vector<4x256xf32>
    %51 = arith.addf %50, %49 : vector<4x256xf32>
    %52 = arith.divf %50, %51 : vector<4x256xf32>
    %53 = arith.mulf %47, %52 : vector<4x256xf32>
    %54 = arith.truncf %53 : vector<4x256xf32> to vector<4x256xbf16>
    %c0_44 = arith.constant 0 : index
    %c0_45 = arith.constant 0 : index
    %55 = vector.load %arg3[%c0_44, %c0_45] : memref<256x35xbf16, #tpu.memory_space<vmem>>, vector<256x35xbf16>
    %cst_46 = arith.constant dense<0.000000e+00> : vector<4x35xf32>
    %56 = tpu.matmul %54, %55, %cst_46 {dimension_numbers = #tpu.dot_dimension_numbers<[1], [0], [0], [1], [0, 0, 1, 1], [], []>} : vector<4x256xbf16>, vector<256x35xbf16>, vector<4x35xf32> -> vector<4x35xf32>
    %c0_47 = arith.constant 0 : index
    %c0_48 = arith.constant 0 : index
    %57 = vector.load %arg4[%c0_47, %c0_48] : memref<4x35xf32, #tpu.memory_space<vmem>>, vector<4x35xf32>
    %58 = arith.mulf %56, %57 : vector<4x35xf32>
    %59 = vector.extract_strided_slice %58 {offsets = [0, 0], sizes = [4, 1], strides = [1, 1]} : vector<4x35xf32> to vector<4x1xf32>
    %60 = vector.extract_strided_slice %58 {offsets = [0, 1], sizes = [4, 9], strides = [1, 1]} : vector<4x35xf32> to vector<4x9xf32>
    %cst_49 = arith.constant dense<0.000000e+00> : vector<4xf32>
    %61 = vector.multi_reduction <add>, %60, %cst_49 [1] : vector<4x9xf32> to vector<4xf32>
    %62 = vector.shape_cast %61 : vector<4xf32> to vector<4x1xf32>
    %63 = vector.extract_strided_slice %58 {offsets = [0, 10], sizes = [4, 25], strides = [1, 1]} : vector<4x35xf32> to vector<4x25xf32>
    %cst_50 = arith.constant dense<0.000000e+00> : vector<4xf32>
    %64 = vector.multi_reduction <add>, %63, %cst_50 [1] : vector<4x25xf32> to vector<4xf32>
    %65 = vector.shape_cast %64 : vector<4xf32> to vector<4x1xf32>
    %66 = tpu.concatenate %59, %62, %65 in 0 : vector<4x1xf32>, vector<4x1xf32>, vector<4x1xf32> -> vector<12x1xf32>
    %c0_51 = arith.constant 0 : index
    %c0_52 = arith.constant 0 : index
    %67 = vector.load %arg5[%c0_51, %c0_52] : memref<8x12xf32, #tpu.memory_space<vmem>>, vector<8x12xf32>
    %cst_53 = arith.constant dense<0.000000e+00> : vector<8x1xf32>
    %68 = tpu.matmul %67, %66, %cst_53 {dimension_numbers = #tpu.dot_dimension_numbers<[1], [0], [0], [1], [0, 0, 1, 1], [], []>} : vector<8x12xf32>, vector<12x1xf32>, vector<8x1xf32> -> vector<8x1xf32>
    %69 = arith.negf %68 : vector<8x1xf32>
    %70 = math.exp %69 : vector<8x1xf32>
    %cst_54 = arith.constant 1.000000e+00 : f32
    %71 = vector.broadcast %cst_54 : f32 to vector<8x1xf32>
    %72 = arith.addf %71, %70 : vector<8x1xf32>
    %73 = arith.divf %71, %72 : vector<8x1xf32>
    %c0_55 = arith.constant 0 : index
    %c0_56 = arith.constant 0 : index
    %c0_57 = arith.constant 0 : index
    %74 = vector.load %arg1[%c0_55, %c0_56, %c0_57] : memref<1x8x384xf32, #tpu.memory_space<vmem>>, vector<1x8x256xf32>
    %75 = vector.shape_cast %74 : vector<1x8x256xf32> to vector<8x256xf32>
    %76 = vector.broadcast %73 : vector<8x1xf32> to vector<8x256xf32>
    %77 = arith.mulf %75, %76 : vector<8x256xf32>
    %c0_58 = arith.constant 0 : index
    %c0_59 = arith.constant 0 : index
    %c0_60 = arith.constant 0 : index
    %78 = vector.load %arg6[%c0_58, %c0_59, %c0_60] : memref<1x8x256xf32, #tpu.memory_space<vmem>>, vector<1x8x256xf32>
    %79 = vector.shape_cast %78 : vector<1x8x256xf32> to vector<8x256xf32>
    %80 = vector.shape_cast %77 : vector<8x256xf32> to vector<1x8x256xf32>
    tpu.vector_store %arg6[%c0_58, %c0_59, %c0_60], %80 {strides = array<i32>} : memref<1x8x256xf32, #tpu.memory_space<vmem>>, vector<1x8x256xf32>,
    return
  }
  func.func @transform_0(%arg0: i32) -> (i32, i32, i32) {
    %c0_i32 = arith.constant 0 : i32
    %c0_i32_0 = arith.constant 0 : i32
    %c0_i32_1 = arith.constant 0 : i32
    return %arg0, %c0_i32, %c0_i32_0 : i32, i32, i32
  }
  func.func @transform_1(%arg0: i32) -> (i32, i32, i32) {
    %c0_i32 = arith.constant 0 : i32
    %c0_i32_0 = arith.constant 0 : i32
    %c0_i32_1 = arith.constant 0 : i32
    %c0_i32_2 = arith.constant 0 : i32
    return %c0_i32, %c0_i32_0, %c0_i32_1 : i32, i32, i32
  }
  func.func @transform_2(%arg0: i32) -> (i32, i32) {
    %c0_i32 = arith.constant 0 : i32
    %c0_i32_0 = arith.constant 0 : i32
    %c0_i32_1 = arith.constant 0 : i32
    return %c0_i32, %c0_i32_0 : i32, i32
  }
  func.func @transform_3(%arg0: i32) -> (i32, i32) {
    %c0_i32 = arith.constant 0 : i32
    %c0_i32_0 = arith.constant 0 : i32
    %c0_i32_1 = arith.constant 0 : i32
    return %c0_i32, %c0_i32_0 : i32, i32
  }
  func.func @transform_4(%arg0: i32) -> (i32, i32) {
    %c0_i32 = arith.constant 0 : i32
    %c0_i32_0 = arith.constant 0 : i32
    %c0_i32_1 = arith.constant 0 : i32
    return %c0_i32, %c0_i32_0 : i32, i32
  }
  func.func @transform_5(%arg0: i32) -> (i32, i32, i32) {
    %c0_i32 = arith.constant 0 : i32
    %c0_i32_0 = arith.constant 0 : i32
    %c0_i32_1 = arith.constant 0 : i32
    return %arg0, %c0_i32, %c0_i32_0 : i32, i32, i32
  }
}

</mosaic_0001>

<bundles_post_ra>
// kernel: mscam_v4.1
= control target key start
LH: loop header
LB: loop body
LE: loop exit
PB: predicated region body
PF: predicated region fallthrough
CT: control target
= control target key end

     0   :  { %s1410_s18 = smov 0   ;;  %s1589_s0 = inlined_call_operand.vmem [shape: f32[2,8,384], index: 0, kind: input, shape index: {}]   ;;  %s1590_s1 = inlined_call_operand.vmem [shape: bf16[9,4,8], index: 1, kind: input, shape index: {}]   ;;  %s1591_s2 = inlined_call_operand.vmem [shape: bf16[256,35], index: 2, kind: input, shape index: {}]   ;;  %s1592_s3 = inlined_call_operand.vmem [shape: f32[4,35], index: 3, kind: input, shape index: {}]   ;;  %s1593_s4 = inlined_call_operand.vmem [shape: f32[8,12], index: 4, kind: input, shape index: {}]   ;;  %s1594_s5 = inlined_call_operand.vmem [shape: f32[2,8,256], index: 5, kind: output, shape index: {}]  }
   0x1 LB: > { %s1170_s19 = sadd.s32 4294967295, %s1364_s18   ;;  %p1174_p0 = scmp.ge.s32.totalorder %s1364_s18, 1  ;;  %s1364_s18 = sphi %s1410_s18, %s15_s18  }
   0x2   : > { %p187_p1 = scmp.lt.s32.totalorder %s1364_s18, 3 }
   0x4   : > { %p188_p2 = pnand %p1174_p0, %p187_p1 }
   0x5   : > { %p215_p3 = scmp.lt.s32.totalorder (!%p188_p2), %s1170_s19, 1  ;;  %v1366_v5 = vmov (!%p188_p2), 0   ;;  %s1367_s24 = smov (!%p188_p2), 126   ;;  %vm382_vm0 = vcmask (!%p188_p2), 1031168   ;;  %vm271_vm1 = vcmask (!%p188_p2), 1043456   ;;  %vm445_vm2 = vcmask (!%p188_p2), 916480  }
   0x6   : > { %191 = sbr.rel (%p188_p2) target bundleno = 1318 (0x526), region = 40  ;;  %426 = vmatprep.mubr.bf16.mxu0 (!%p188_p2), %v1366_v5  ;;  %310 = vmatprep.mubr.bf16.mxu1 (!%p188_p2), %v1366_v5  ;;  %s1368_s25 = smov (!%p188_p2), 112   ;;  %vm267_vm3 = vcmask (!%p188_p2), 64512   ;;  %v1190_v15 = vld [vmem:[%s1590_s1 + $0x4] sm:$0x3] (!%p188_p2)  ;;  %vm508_vm4 = vcmask (!%p188_p2), 908288  }
   0x7   : > { %1326 = vset.pattern.permute.xlu0 (!%p188_p2), %v1366_v5  ;;  %s1369_s26 = smov (!%p188_p2), 111   ;;  %s1370_s27 = smov (!%p188_p2), 110   ;;  %v1193_v27 = vld [vmem:[%s1590_s1 + $0x6] sm:$0x3] (!%p188_p2)  ;;  %vm571_vm5 = vcmask (!%p188_p2), 900096   ;;  %vm634_vm6 = vcmask (!%p188_p2), 785408  }
   0x8   : > { %s1371_s28 = smov (!%p188_p2), 96   ;;  %s1372_s29 = smov (!%p188_p2), 127   ;;  %vm264_vm7 = vcmask (!%p188_p2), 1039360   ;;  %v1196_v37 = vld [vmem:[%s1590_s1 + $0x8] sm:$0x3] (!%p188_p2)  ;;  %vm697_vm8 = vcmask (!%p188_p2), 777216  }
   0x9   : > { %s1373_s30 = smov (!%p188_p2), 95   ;;  %s1374_s6 = smov (!%p188_p2), 94   ;;  %v1180_v46 = vld [vmem:[%s1590_s1 + $0x2] sm:$0x3] (!%p188_p2)  ;;  %v1199_v51 = vld [vmem:[%s1590_s1 + $0xa] sm:$0x3] (!%p188_p2) }
   0xa   : > { %v244_v55 = vld [vmem:[%s1590_s1] sm:$0x3] (!%p188_p2)  ;;  %vm760_vm9 = vcmask (!%p188_p2), 769024   ;;  %v1202_v59 = vld [vmem:[%s1590_s1 + $0xc] sm:$0x3] (!%p188_p2)  ;;  %s1375_s15 = smov (!%p188_p2), 118  }
   0xb   : > { %v1205_v63 = vld [vmem:[%s1590_s1 + $0xe] sm:$0x3] (!%p188_p2)  ;;  %vm1012_vm10 = vcmask (!%p188_p2), 199680   ;;  %vm1005_vm11 = vcmask (!%p188_p2), 68608   ;;  %vm1377_vm12 = vmmov (!%p188_p2), 0   ;;  %vm1379_vm13 = vmmov (!%p188_p2), 1  }
   0xc   : > { %vm1271_vm14 = vmpackc.low (!%p188_p2), %vm271_vm1, %vm1379_vm13  ;;  %vm1021_vm15 = vcmask (!%p188_p2), 97280  }
   0xd   : > { %s1596_s19 = smov (!%p215_p3, %s1170_s19), 1 }
   0xe   : > { %s1303_s20 = smul.u32 24, %s1596_s19  ;;  %s1234_s17 = sshll.u32 %s1596_s19, 4 }
   0xf   : > { %s224_s22 = scalar_lea.vmem %s1594_s5, %s1234_s17 }
  0x10   : > { %s219_s23 = scalar_lea.vmem %s1589_s0, %s1303_s20 }
  0x11   : > { %v228_v0 = vld [vmem:[%s219_s23 + $0x10] sm:$0xff]  ;;  %v1424_v1 = vld [vmem:[%s219_s23] sm:$0xff]  ;;  %v1426_v2 = vld [vmem:[%s219_s23 + $0x8] sm:$0xff] }
  0x12   : > { %v1236_v3 = vpack.c.bf16 %v228_v0, %v228_v0  ;;  %v1430_v4 = vpack.c.bf16 %v1424_v1, %v1424_v1  ;;  %v1438_v6 = vpack.c.bf16 %v1426_v2, %v1426_v2 }
  0x14   : > { %243 = vst [vmem:[#allocation2 + $0x8] sm:$0xf] %v1236_v3  ;;  %376 = vrot.lane.b32.xlu0 %v1430_v4, %s1367_s24  ;;  %v328_v47 = vsel %vm271_vm1, %v1430_v4, 0  ;;  %v1208_v3 = vld [vmem:[%s1590_s1 + $0x10] sm:$0x3] }
  0x18   : > { %378 = vrot.lane.b32.xlu0 %v1438_v6, %s1367_s24 }
  0x1b   : > { %v1327_v7 = vld [vmem:[#allocation2 + $0x8] ss:$0 sps:$4 sm:$0xff]  }
  0x1c   : > { %380 = vrot.lane.b32.xlu1 %v1327_v7, %s1367_s24  ;;  %441 = vrot.lane.b32.xlu0 %v1438_v6, %s1368_s25 }
  0x20   : > { %439 = vrot.lane.b32.xlu1 %v1430_v4, %s1368_s25  ;;  %502 = vrot.lane.b32.xlu0 %v1430_v4, %s1369_s26 }
  0x24   : > { %443 = vrot.lane.b32.xlu1 %v1327_v7, %s1368_s25  ;;  %506 = vrot.lane.b32.xlu0 %v1327_v7, %s1369_s26 }
  0x28   : > { %504 = vrot.lane.b32.xlu1 %v1438_v6, %s1369_s26  ;;  %567 = vrot.lane.b32.xlu0 %v1438_v6, %s1370_s27 }
  0x2c   : > { %565 = vrot.lane.b32.xlu1 %v1430_v4, %s1370_s27  ;;  %628 = vrot.lane.b32.xlu0 %v1430_v4, %s1371_s28 }
  0x30   : > { %569 = vrot.lane.b32.xlu1 %v1327_v7, %s1370_s27  ;;  %632 = vrot.lane.b32.xlu0 %v1327_v7, %s1371_s28 }
  0x34   : > { %630 = vrot.lane.b32.xlu1 %v1438_v6, %s1371_s28  ;;  %260 = vrot.lane.b32.xlu0 %v1438_v6, %s1372_s29 }
  0x38   : > { %258 = vrot.lane.b32.xlu1 %v1430_v4, %s1372_s29  ;;  %691 = vrot.lane.b32.xlu0 %v1430_v4, %s1373_s30 }
  0x3c   : > { %262 = vrot.lane.b32.xlu1 %v1327_v7, %s1372_s29  ;;  %695 = vrot.lane.b32.xlu0 %v1327_v7, %s1373_s30 }
  0x40   : > { %693 = vrot.lane.b32.xlu1 %v1438_v6, %s1373_s30  ;;  %756 = vrot.lane.b32.xlu0 %v1438_v6, %s1374_s6 }
  0x44   : > { %754 = vrot.lane.b32.xlu1 %v1430_v4, %s1374_s6  ;;  %v1328_v4 = vld [vmem:[%s1591_s2 + $0x40] sm:$0xff]  }
  0x48   : > { %758 = vrot.lane.b32.xlu1 %v1327_v7, %s1374_s6  ;;  %v1331_v7 = vld [vmem:[%s1591_s2 + $0x8] sm:$0xff]  }
  0x86   : > { %v377_v8 = vpop.permute.xlu0 %376 }
  0x8a   : > { %v379_v9 = vpop.permute.xlu0 %378 }
  0x8b   : > { %v383_v10 = vsel %vm382_vm0, %v377_v8, %v379_v9  ;;  %v1332_v8 = vld [vmem:[%s1591_s2 + $0x50] sm:$0xff]  }
  0x8c   : > { %v389_v14 = vsel %vm271_vm1, %v383_v10, 0  ;;  %v1334_v10 = vld [vmem:[%s1591_s2 + $0x58] sm:$0xff]  }
  0x8e   : > { %v381_v11 = vpop.permute.xlu1 %380  ;;  %v442_v13 = vpop.permute.xlu0 %441 }
  0x8f   : > { %v384_v12 = vsel %vm382_vm0, %v379_v9, %v381_v11  ;;  %v1333_v9 = vld [vmem:[%s1591_s2 + $0x10] sm:$0xff]   ;;  %v1335_v11 = vld [vmem:[%s1591_s2 + $0x18] sm:$0xff]  }
  0x90   : > { %1191 = vmatprep.subr.msk.bf16.mxu0 %vm271_vm1, %v384_v12  ;;  %v1336_v12 = vld [vmem:[%s1591_s2 + $0x60] sm:$0xff]  }
  0x91   : > { %395 = vmatpush1.bf16.msra.mxu0 %v389_v14  ;;  %v1338_v14 = vld [vmem:[%s1591_s2 + $0x68] sm:$0xff]  }
  0x92   : > { %v440_v16 = vpop.permute.xlu1 %439  ;;  %v503_v18 = vpop.permute.xlu0 %502 }
  0x93   : > { %v446_v17 = vsel %vm445_vm2, %v440_v16, %v442_v13  ;;  %v1340_v16 = vld [vmem:[%s1591_s2 + $0x70] sm:$0xff]  }
  0x94   : > { %1192 = vmatmul.mubr.msk.bf16.vlgmr.msra.gmra.mrb[0].mxu0 %vm267_vm3, %v1190_v15  ;;  %v452_v20 = vsel %vm271_vm1, %v446_v17, 0  ;;  %v1339_v15 = vld [vmem:[%s1591_s2 + $0x28] sm:$0xff]   ;;  %v1341_v17 = vld [vmem:[%s1591_s2 + $0x30] sm:$0xff]  }
  0x95   : > { %489 = vmatprep.mubr.bf16.mxu0 %v1366_v5 }
  0x96   : > { %v444_v19 = vpop.permute.xlu1 %443  ;;  %v507_v22 = vpop.permute.xlu0 %506 }
  0x97   : > { %v447_v21 = vsel %vm445_vm2, %v442_v13, %v444_v19  ;;  %v1337_v13 = vld [vmem:[%s1591_s2 + $0x20] sm:$0xff]   ;;  %v1343_v19 = vld [vmem:[%s1591_s2 + $0x38] sm:$0xff]  }
  0x98   : > { %1194 = vmatprep.subr.msk.bf16.mxu0 %vm271_vm1, %v447_v21 }
  0x99   : > { %458 = vmatpush1.bf16.msra.mxu0 %v452_v20 }
  0x9a   : > { %v505_v23 = vpop.permute.xlu1 %504  ;;  %v568_v26 = vpop.permute.xlu0 %567 }
  0x9b   : > { %v509_v24 = vsel %vm508_vm4, %v503_v18, %v505_v23  ;;  %v510_v25 = vsel %vm508_vm4, %v505_v23, %v507_v22  ;;  %v1342_v18 = vld [vmem:[%s1591_s2 + $0x78] sm:$0xff]  }
  0x9c   : > { %1197 = vmatprep.subr.msk.bf16.mxu0 %vm271_vm1, %v510_v25  ;;  %v515_v28 = vsel %vm271_vm1, %v509_v24, 0 }
  0x9e   : > { %v566_v29 = vpop.permute.xlu1 %565  ;;  %v629_v30 = vpop.permute.xlu0 %628 }
  0x9f   : > { %v572_v35 = vsel %vm571_vm5, %v566_v29, %v568_v26 }
  0xa0   : > { %1195 = vmatmul.mubr.msk.bf16.vlgmr.msra.gmra.mrb[0].mxu0 %vm267_vm3, %v1193_v27  ;;  %v578_v38 = vsel %vm271_vm1, %v572_v35, 0 }
  0xa1   : > { %521 = vmatpush1.bf16.msra.mxu0 %v515_v28  ;;  %552 = vmatprep.mubr.bf16.mxu0 %v1366_v5 }
  0xa2   : > { %v570_v31 = vpop.permute.xlu1 %569  ;;  %v633_v33 = vpop.permute.xlu0 %632 }
  0xa3   : > { %v573_v32 = vsel %vm571_vm5, %v568_v26, %v570_v31 }
  0xa4   : > { %1200 = vmatprep.subr.msk.bf16.mxu0 %vm271_vm1, %v573_v32 }
  0xa6   : > { %v631_v34 = vpop.permute.xlu1 %630  ;;  %v261_v36 = vpop.permute.xlu0 %260 }
  0xa7   : > { %v636_v40 = vsel %vm634_vm6, %v631_v34, %v633_v33  ;;  %v635_v48 = vsel %vm634_vm6, %v629_v30, %v631_v34 }
  0xa8   : > { %v641_v52 = vsel %vm271_vm1, %v635_v48, 0 }
  0xaa   : > { %v259_v39 = vpop.permute.xlu1 %258  ;;  %v692_v44 = vpop.permute.xlu0 %691 }
  0xab   : > { %v265_v41 = vsel %vm264_vm7, %v259_v39, %v261_v36 }
  0xac   : > { %1198 = vmatmul.mubr.msk.bf16.vlgmr.msra.gmra.mrb[0].mxu0 %vm267_vm3, %v1196_v37  ;;  %v273_v43 = vsel %vm271_vm1, %v265_v41, 0 }
  0xad   : > { %584 = vmatpush1.bf16.msra.mxu0 %v578_v38  ;;  %615 = vmatprep.mubr.bf16.mxu0 %v1366_v5 }
  0xae   : > { %1203 = vmatprep.subr.msk.bf16.mxu0 %vm271_vm1, %v636_v40  ;;  %v263_v42 = vpop.permute.xlu1 %262  ;;  %v696_v50 = vpop.permute.xlu0 %695 }
  0xaf   : > { %v266_v45 = vsel %vm264_vm7, %v261_v36, %v263_v42 }
  0xb0   : > { %1184 = vmatprep.subr.msk.bf16.mxu1 %vm271_vm1, %v266_v45 }
  0xb1   : > { %279 = vmatpush1.bf16.msra.mxu1 %v273_v43 }
  0xb2   : > { %1188 = vmatprep.subr.msk.bf16.mxu1 %vm271_vm1, %v1438_v6  ;;  %v694_v49 = vpop.permute.xlu1 %693  ;;  %v757_v58 = vpop.permute.xlu0 %756  ;;  %v1329_v6 = vld [vmem:[%s1591_s2] sm:$0xff]  }
  0xb3   : > { %v699_v53 = vsel %vm697_vm8, %v694_v49, %v696_v50  ;;  %v698_v56 = vsel %vm697_vm8, %v692_v44, %v694_v49  ;;  %v999_v44 = vld [vmem:[%s1592_s3] sm:$0xf] }
  0xb4   : > { %1185 = vmatmul.mubr.msk.bf16.vlgmr.msra.gmra.mrb[0].mxu1 %vm267_vm3, %v1180_v46  ;;  %v704_v60 = vsel %vm271_vm1, %v698_v56, 0 }
  0xb5   : > { %334 = vmatpush1.bf16.msra.mxu1 %v328_v47  ;;  %365 = vmatprep.mubr.bf16.mxu1 %v1366_v5 }
  0xb6   : > { %v755_v54 = vpop.permute.xlu1 %754  ;;  %1237 = vmatprep.subr.bf16.mxu1 %v1328_v4 }
  0xb7   : > { %v761_v62 = vsel %vm760_vm9, %v755_v54, %v757_v58  ;;  %v1378_v54 = vmov 0.0  }
  0xb8   : > { %1201 = vmatmul.mubr.msk.bf16.vlgmr.msra.gmra.mrb[0].mxu0 %vm267_vm3, %v1199_v51  ;;  %v767_v0 = vsel %vm271_vm1, %v761_v62, 0 }
  0xb9   : > { %647 = vmatpush1.bf16.msra.mxu0 %v641_v52  ;;  %678 = vmatprep.mubr.bf16.mxu0 %v1366_v5 }
  0xba   : > { %1206 = vmatprep.subr.msk.bf16.mxu0 %vm271_vm1, %v699_v53  ;;  %v759_v57 = vpop.permute.xlu1 %758  ;;  %v1376_v53 = vmov 0.0|0.0  }
  0xbb   : > { %v762_v61 = vsel %vm760_vm9, %v757_v58, %v759_v57 }
  0xc0   : > { %1189 = vmatmul.mubr.msk.bf16.vlgmr.msra.gmra.mrb[0].mxu1 %vm267_vm3, %v244_v55 }
  0xc1   : > { %1238 = vmatpush3.bf16.msra.mxu1 %v1329_v6 }
  0xc4   : > { %1204 = vmatmul.mubr.msk.bf16.vlgmr.msra.gmra.mrb[0].mxu0 %vm267_vm3, %v1202_v59 }
  0xc5   : > { %710 = vmatpush1.bf16.msra.mxu0 %v704_v60  ;;  %741 = vmatprep.mubr.bf16.mxu0 %v1366_v5  ;;  %v1020_v60 = vld [vmem:[%s1593_s4] sm:$0xff] }
  0xc6   : > { %1209 = vmatprep.subr.msk.bf16.mxu0 %vm271_vm1, %v762_v61 }
  0xd0   : > { %1207 = vmatmul.mubr.msk.bf16.vlgmr.msra.gmra.mrb[0].mxu0 %vm267_vm3, %v1205_v63 }
  0xd1   : > { %773 = vmatpush1.bf16.msra.mxu0 %v767_v0  ;;  %804 = vmatprep.mubr.bf16.mxu0 %v1366_v5  ;;  %v1330_v5 = vld [vmem:[%s1591_s2 + $0x48] sm:$0xff]  }
  0xd2   : > { %1239 = vmatprep.subr.bf16.mxu1 %v1330_v5 }
  0xd3   : > { %1240 = vmatpush3.bf16.msra.mxu1 %v1331_v7 }
  0xd4   : > { %1241 = vmatprep.subr.bf16.mxu1 %v1332_v8 }
  0xd7   : > { %1242 = vmatpush3.bf16.msra.mxu1 %v1333_v9 }
  0xd8   : > { %1243 = vmatprep.subr.bf16.mxu1 %v1334_v10 }
  0xdb   : > { %1244 = vmatpush3.bf16.msra.mxu1 %v1335_v11 }
  0xdc   : > { %1210 = vmatmul.mubr.msk.bf16.vlgmr.msra.gmra.mrb[0].mxu0 %vm267_vm3, %v1208_v3  ;;  %1245 = vmatprep.subr.bf16.mxu1 %v1336_v12 }
  0xdf   : > { %1246 = vmatpush3.bf16.msra.mxu1 %v1337_v13 }
  0xe0   : > { %1247 = vmatprep.subr.bf16.mxu1 %v1338_v14 }
  0xe3   : > { %1248 = vmatpush3.bf16.msra.mxu1 %v1339_v15 }
  0xe4   : > { %1249 = vmatprep.subr.bf16.mxu1 %v1340_v16 }
  0xe7   : > { %1250 = vmatpush3.bf16.msra.mxu1 %v1341_v17 }
  0xe8   : > { %1251 = vmatprep.subr.bf16.mxu1 %v1342_v18 }
  0xeb   : > { %1252 = vmatpush3.bf16.msra.mxu1 %v1343_v19 }
  0xec   : > { %1269 = vmatprep.subr.bf16.mxu1 %v1376_v53 }
 0x193   : > { %v367_v20 = vpop.f32.mrb[0].mxu1 }
 0x194   : > { %v369_v21 = vpop.f32.mrb[1].mxu1 }
 0x195   : > { %v371_v22 = vpop.f32.mrb[2].mxu1 }
 0x196   : > { %v372_v23 = vpop.f32.mrb[3].mxu1 }
 0x1af   : > { %v806_v24 = vpop.f32.mrb[0].mxu0 }
 0x1b0   : > { %v1273_v25 = vadd.f32 %v806_v24, %v367_v20  ;;  %v808_v26 = vpop.f32.mrb[1].mxu0 }
 0x1b1   : > { %v1274_v27 = vadd.f32 %v808_v26, %v369_v21  ;;  %v810_v28 = vpop.f32.mrb[2].mxu0 }
 0x1b2   : > { %v1211_v29 = vmul.f32 -1.442695, %v1273_v25  ;;  %v811_v30 = vpop.f32.mrb[3].mxu0 }
 0x1b3   : > { %v1212_v31 = vmul.f32 -1.442695, %v1274_v27 }
 0x1b4   : > { %1344 = vpow2.f32 %v1211_v29 }
 0x1b5   : > { %1346 = vpow2.f32 %v1212_v31 }
 0x1be   : > { %v1345_v32 = vpop.eup %1344 }
 0x1bf   : > { %v1347_v33 = vpop.eup %1346  ;;  %v821_v34 = vadd.f32 1.0, %v1345_v32 }
 0x1c0   : > { %v822_v35 = vadd.f32 1.0, %v1347_v33 }
 0x1c1   : > { %1348 = vrcp.f32 %v821_v34 }
 0x1c2   : > { %1350 = vrcp.f32 %v822_v35 }
 0x1cb   : > { %v1349_v36 = vpop.eup %1348 }
 0x1cc   : > { %v1351_v37 = vpop.eup %1350  ;;  %v827_v38 = vmul.f32 %v1349_v36, %v1273_v25 }
 0x1cd   : > { %v828_v39 = vmul.f32 %v1351_v37, %v1274_v27 }
 0x1ce   : > { %v829_v41 = vpack.c.bf16 %v827_v38, %v827_v38 }
 0x1cf   : > { %v830_v40 = vpack.c.bf16 %v828_v39, %v828_v39 }
 0x1d1   : > { %991 = vmatprep.mubr.bf16.mxu1 %v830_v40 }
 0x1d2   : > { %992 = vmatmul.mubr.bf16.vlgmr.msra.gmra.mrb[4].mxu1 %v829_v41 }
 0x1d3   : > { %1266 = vmatprep.mubr.msk.f32.mxu1 %vm1377_vm12, %v1378_v54 }
 0x2a5   : > { %v1253_v42 = vpop.f32.mrb[4].mxu1 }
 0x2a6   : > { %v1254_v43 = vpop.f32.mrb[5].mxu1 }
 0x2a7   : > { %v1255_v45 = vadd.f32 %v1254_v43, %v1253_v42  ;;  %v1256_v46 = vpop.f32.mrb[6].mxu1 }
 0x2a8   : > { %v1257_v47 = vpop.f32.mrb[7].mxu1 }
 0x2a9   : > { %v1000_v48 = vmul.f32 %v1255_v45, %v999_v44 }
 0x2ab   : > { %1009 = vrot.lane.b32.xlu1 %v1000_v48, %s1375_s15  ;;  %1002 = vrot.lane.b32.xlu0 %v1000_v48, %s1372_s29 }
 0x31d   : > { %v1010_v49 = vpop.permute.xlu1 %1009  ;;  %v1003_v50 = vpop.permute.xlu0 %1002 }
 0x31e   : > { %v1013_v51 = vsel %vm1012_vm10, %v1010_v49, 0.0  ;;  %v1006_v52 = vsel %vm1005_vm11, %v1003_v50, 0.0 }
 0x31f   : > { %1014 = vadd.xlane.f32.xlu1 %v1013_v51  ;;  %1007 = vadd.xlane.f32.xlu0 %v1006_v52 }
 0x3ac   : > { %v1008_v55 = vpop.xlane.xlu0 %1007  ;;  %v1015_v57 = vpop.xlane.xlu1 %1014 }
 0x3ad   : > { %v1017_v56 = vrot.slane %v1008_v55, 4 }
 0x3af   : > { %v1019_v58 = vsel %vm271_vm1, %v1000_v48, %v1017_v56 }
 0x3b0   : > { %v1270_v59 = vpack.c.bf16 %v1015_v57, %v1019_v58 }
 0x3b2   : > { %1272 = vmatpush3.bf16.msk.msra.mxu1 %vm1271_vm14, %v1270_v59 }
 0x3b5   : > { %1267 = vmatmul.mubr.msk.f32.vlgmr.msra.gmra.mrb[8].mxu1 %vm1021_vm15, %v1020_v60 }
 0x488   : > { %v1094_v61 = vpop.f32.mrb[8].mxu1 }
 0x489   : > { %v1231_v62 = vmul.f32 -1.442695, %v1094_v61  ;;  %v1268_v63 = vpop.f32.mrb[9].mxu1 }
 0x48b   : > { %1352 = vpow2.f32 %v1231_v62 }
 0x495   : > { %v1353_v0 = vpop.eup %1352 }
 0x496   : > { %v1101_v3 = vadd.f32 1.0, %v1353_v0 }
 0x498   : > { %1354 = vrcp.f32 %v1101_v3 }
 0x4a2   : > { %v1355_v4 = vpop.eup %1354 }
 0x4a3   : > { %1108 = vperm.xlu0 %1326, %v1355_v4  }
 0x522   : > { %v1109_v6 = vpop.permute.xlu0 %1108 }
 0x523   : > { %v1111_v5 = vmul.f32 %v1109_v6, %v1424_v1  ;;  %v1112_v7 = vmul.f32 %v1109_v6, %v1426_v2 }
 0x525   : > { %1113 = vst [vmem:[%s224_s22] sm:$0xff] %v1111_v5  ;;  %1114 = vst [vmem:[%s224_s22 + $0x8] sm:$0xff] %v1112_v7 }
 0x526 PF: > { %s15_s18 = sadd.s32 1, %s1364_s18  }
 0x527   : > { %p12_p4 = scmp.ge.s32.totalorder %s15_s18, 4  }
 0x529   :  { %14 = sbr.rel (!%p12_p4) target bundleno = 1 (0x1), region = 78 }

</bundles_post_ra>
